<compile_context>
chip_gen: v7x
topology: tpu7x:2x2x1
jax: 0.10.0
libtpu: 0.0.40
codegen_flags: <defaults>
</compile_context>

<pallas_src>
import functools

import jax
import jax.numpy as jnp
from jax.experimental import pallas as pl
from jax.experimental.pallas import tpu as pltpu


def _round_up(x: int, m: int) -> int:
    return ((x + m - 1) // m) * m


def _embed_kernel(ids_ref, w_ref, o_ref, *, vocab: int):
    # ids_ref: VMEM (tb, 1) int32   -- token ids for this tile
    # w_ref:   VMEM (vocab, D) f32  -- full embedding table (constant block)
    # o_ref:   VMEM (tb, D) f32     -- output tile
    ids = ids_ref[...]                                              # (tb, 1)
    tb = ids.shape[0]
    col = jax.lax.broadcasted_iota(jnp.int32, (tb, vocab), 1)       # (tb, V)
    one_hot = (ids == col).astype(w_ref.dtype)                      # (tb, V)
    # Single MXU matmul fills the whole (tb, D) tile and stores it with
    # full-width lane-dense vst (no per-row masked stores, no scalar loop).
    o_ref[...] = jnp.dot(
        one_hot, w_ref[...], preferred_element_type=jnp.float32
    ).astype(o_ref.dtype)


# Conservative budgets so the resident-table design never evicts the pipeline
# buffers (v7x has only 64 MiB physical VMEM, ~32 MiB scoped by default; keep
# the table + double-buffered ids/output tiles well under that everywhere).
_TABLE_VMEM_BUDGET = 8 * 1024 * 1024    # bytes for the VMEM-resident table
_ONEHOT_VMEM_BUDGET = 2 * 1024 * 1024   # bytes for the in-kernel one-hot tile


def embedding_lookup(indices: jax.Array, weights: jax.Array, *, tb: int = 512) -> jax.Array:
    """weights[indices] via a Pallas one-hot-matmul gather kernel.

    indices: integer array of any shape, values in [0, num_embeddings)
    weights: (num_embeddings, D) float table
    returns: indices.shape + (D,)
    """
    num_embeddings, d = weights.shape

    table_bytes = num_embeddings * d * weights.dtype.itemsize
    if table_bytes > _TABLE_VMEM_BUDGET:
        # TODO(synk): large tables need an HBM-resident weights ref
        # (memory_space=pl.ANY) with a double-buffered per-row DMA gather
        # pipeline; fall back to the XLA gather for now.
        return jnp.take(weights, indices, axis=0)

    flat_ids = indices.reshape(-1).astype(jnp.int32)
    n_tok = flat_ids.shape[0]

    # Token tile: as large as the budgets allow, clamped to the actual token
    # count, and kept a multiple of 8 (sublane constraint on the blocks).
    max_tb_onehot = max(8, (_ONEHOT_VMEM_BUDGET // (num_embeddings * 4)) // 8 * 8)
    tb_eff = min(tb, max_tb_onehot, _round_up(n_tok, 8))
    tb_eff = max(8, (tb_eff // 8) * 8)

    n_pad = pl.cdiv(n_tok, tb_eff) * tb_eff
    if n_pad != n_tok:
        # Pad with an out-of-range sentinel id: padded rows become exact zeros
        # (empty one-hot row) and are sliced off below.
        flat_ids = jnp.pad(flat_ids, (0, n_pad - n_tok),
                           constant_values=num_embeddings)
    ids_2d = flat_ids.reshape(n_pad, 1)

    kernel = functools.partial(_embed_kernel, vocab=num_embeddings)

    out_flat = pl.pallas_call(
        kernel,
        out_shape=jax.ShapeDtypeStruct((n_pad, d), weights.dtype),
        grid_spec=pltpu.PrefetchScalarGridSpec(
            num_scalar_prefetch=0,
            grid=(n_pad // tb_eff,),
            in_specs=[
                # Ids tile for this grid step (vectorized one-hot comparison).
                pl.BlockSpec((tb_eff, 1), lambda i: (i, 0)),
                # Full weight table resident in VMEM; block index is constant
                # so the DMA only happens once.
                pl.BlockSpec((num_embeddings, d), lambda i: (0, 0)),
            ],
            out_specs=pl.BlockSpec((tb_eff, d), lambda i: (i, 0)),
        ),
        compiler_params=pltpu.CompilerParams(
            # Token tiles are independent -> parallel (2x on v7x's 2 TCs).
            dimension_semantics=("parallel",),
        ),
    )(ids_2d, weights)

    if n_pad != n_tok:
        out_flat = out_flat[:n_tok]
    return out_flat.reshape(indices.shape + (d,))


class Embedding:
    """JAX/Pallas port of the PyTorch Embedding module above."""

    def __init__(self, num_embeddings: int, embedding_dim: int, key: jax.Array) -> None:
        # Deterministic stand-in for torch.randn(num_embeddings, embedding_dim).
        self.weights = jax.random.normal(
            key, (num_embeddings, embedding_dim), dtype=jnp.float32
        )

    def __call__(self, input_seq: jax.Array) -> jax.Array:
        if not jnp.issubdtype(input_seq.dtype, jnp.integer):
            # PyTorch branch: input_seq == input_seq.long()  (elementwise bool).
            # Cheap elementwise glue; not the hot path, kept in plain JAX.
            truncated = jnp.trunc(input_seq).astype(input_seq.dtype)
            return input_seq == truncated
        return embedding_lookup(input_seq, self.weights)


if __name__ == "__main__":
    key = jax.random.PRNGKey(0)
    k_w, k_idx = jax.random.split(key)

    num_embeddings, embedding_dim = 32, 128
    batch, seq = 2, 8

    emb = Embedding(num_embeddings, embedding_dim, k_w)

    idx = jax.random.randint(k_idx, (batch, seq), 0, num_embeddings, dtype=jnp.int32)

    out = jax.block_until_ready(emb(idx))

    # Correctness check against plain-JAX gather.
    ref = jnp.take(emb.weights, idx, axis=0)
    assert out.shape == (batch, seq, embedding_dim), out.shape
    assert out.dtype == jnp.float32, out.dtype
    assert jnp.allclose(out, ref, rtol=1e-5, atol=1e-5), (
        "Pallas gather mismatch vs jnp.take reference"
    )

    # Non-integer input branch (elementwise, plain JAX).
    x_f = jax.random.normal(key, (batch, seq), dtype=jnp.float32)
    bool_out = jax.block_until_ready(emb(x_f))
    assert bool_out.dtype == jnp.bool_
    assert bool_out.shape == (batch, seq)

    print("KERNEL_OK")
</pallas_src>

<mosaic_0001>
module attributes {stable_mosaic.version = 11 : i64} {
  func.func @_embed_kernel(%arg0: i32, %arg1: memref<16x1xi32, #tpu.memory_space<vmem>>, %arg2: memref<32x128xf32, #tpu.memory_space<vmem>>, %arg3: memref<16x128xf32, #tpu.memory_space<vmem>>) attributes {dimension_semantics = [#tpu.dimension_semantics<parallel>], iteration_bounds = array<i64: 1>, scalar_prefetch = 0 : i64, scratch_operands = 0 : i64, tpu.core_type = #tpu.core_type<tc>, window_params = [{transform_indices = @transform_0, window_bounds = array<i64: 16, 1>}, {pipeline_mode = #tpu.pipeline_mode<synchronous>, transform_indices = @transform_1, window_bounds = array<i64: 32, 128>}, {transform_indices = @transform_2, window_bounds = array<i64: 16, 128>}]} {
    %c0 = arith.constant 0 : index
    %c0_0 = arith.constant 0 : index
    %0 = vector.load %arg1[%c0, %c0_0] : memref<16x1xi32, #tpu.memory_space<vmem>>, vector<16x1xi32>
    %1 = tpu.iota {dimensions = array<i32: 1>} : vector<16x32xi32>
    %2 = vector.broadcast %0 : vector<16x1xi32> to vector<16x32xi32>
    %3 = arith.cmpi eq, %2, %1 : vector<16x32xi32>
    %4 = arith.extui %3 : vector<16x32xi1> to vector<16x32xi32>
    %5 = arith.sitofp %4 : vector<16x32xi32> to vector<16x32xf32>
    %c0_1 = arith.constant 0 : index
    %c0_2 = arith.constant 0 : index
    %6 = vector.load %arg2[%c0_1, %c0_2] : memref<32x128xf32, #tpu.memory_space<vmem>>, vector<32x128xf32>
    %cst = arith.constant dense<0.000000e+00> : vector<16x128xf32>
    %7 = tpu.matmul %5, %6, %cst {dimension_numbers = #tpu.dot_dimension_numbers<[1], [0], [0], [1], [0, 0, 1, 1], [], []>} : vector<16x32xf32>, vector<32x128xf32>, vector<16x128xf32> -> vector<16x128xf32>
    %c0_3 = arith.constant 0 : index
    %c0_4 = arith.constant 0 : index
    %8 = vector.load %arg3[%c0_3, %c0_4] : memref<16x128xf32, #tpu.memory_space<vmem>>, vector<16x128xf32>
    tpu.vector_store %arg3[%c0_3, %c0_4], %7 {strides = array<i32>} : memref<16x128xf32, #tpu.memory_space<vmem>>, vector<16x128xf32>,
    return
  }
  func.func @transform_0(%arg0: i32) -> (i32, i32) {
    %c0_i32 = arith.constant 0 : i32
    %c0_i32_0 = arith.constant 0 : i32
    return %arg0, %c0_i32 : i32, i32
  }
  func.func @transform_1(%arg0: i32) -> (i32, i32) {
    %c0_i32 = arith.constant 0 : i32
    %c0_i32_0 = arith.constant 0 : i32
    %c0_i32_1 = arith.constant 0 : i32
    return %c0_i32, %c0_i32_0 : i32, i32
  }
  func.func @transform_2(%arg0: i32) -> (i32, i32) {
    %c0_i32 = arith.constant 0 : i32
    %c0_i32_0 = arith.constant 0 : i32
    return %arg0, %c0_i32 : i32, i32
  }
}

</mosaic_0001>

<bundles_post_ra>
// kernel: tpu_custom_call.1
= control target key start
LH: loop header
LB: loop body
LE: loop exit
PB: predicated region body
PF: predicated region fallthrough
CT: control target
= control target key end

     0   :  { %7 = vsyncpa [#allocation3], 0  ;;  %s288_s0 = inlined_call_operand.vmem [shape: s32[16,1], index: 0, kind: input, shape index: {}]   ;;  %s289_s1 = inlined_call_operand.hbm [shape: f32[32,128], index: 1, kind: input, shape index: {}]   ;;  %s290_s2 = inlined_call_operand.hbm [shape: f32[16,128], index: 2, kind: output, shape index: {}]  }
   0x1   :  { %8 = vsyncpa [#allocation4], 0  ;;  %s231_s9 = smov [#allocation2]   ;;  %s183_s13 = scalar_lea.hbm %s289_s1, 512 }
   0x2   :  { %s16_s10 = sshll.u32 %s231_s9, 4  ;;  %p184_p0 = scmp.ne.s32.totalorder %s289_s1, %s183_s13  ;;  %s17_s10 = int_to_ptr.vmem [resolvable:$true] %s16_s10 }
   0x3   :  { %p187_p1 = scmp.lt.u32.totalorder %s183_s13, %s289_s1 }
   0x5   :  { %p189_p2 = pnand %p187_p1, %p184_p0 }
   0x7   :  { %192 = shalt.err (!%p189_p2)
}
   0x8   :  { %s193_s18 = scalar_lea.vmem %s17_s10, 512  ;;  %p198_p4 = scmp.lt.s32.totalorder %s17_s10, %s17_s10 }
   0x9   :  { %p194_p3 = scmp.ne.s32.totalorder %s17_s10, %s193_s18  ;;  %p199_p5 = scmp.lt.s32.totalorder %s193_s18, %s193_s18 }
   0xb   :  { %p200_p6 = por %p199_p5, %p198_p4 }
   0xd   :  { %p201_p7 = pnand %p200_p6, %p194_p3 }
   0xf   :  { %204 = shalt.err (!%p201_p7)
}
  0x10   :  { %s232_s19 = smov 128   ;;  %s233_s20 = smov 8  }
  0x11   :  { %22 = dma.hbm_to_vmem [thread:$0]  %s289_s1, 512, %s17_s10, [#allocation3], %s232_s19, %s232_s19, %s233_s20  }
  0x12   :  { %227 = dma.done.wait [#allocation3], 512  }
  0x13   :  { %228 = vsyncadd [#allocation3], 4294966784  ;;  %v234_v0 = vmov 0   ;;  %v26_v1 = vld [vmem:[%s288_s0] sm:$0xff]  ;;  %v43_v3 = vld [vmem:[#allocation2 + $0x8] sm:$0xff]  ;;  %v28_v9 = vlaneseq  ;;  %vm46_vm0 = vcmask 261120  }
  0x14   :  { %182 = vset.pattern.permute.xlu0 %v234_v0  ;;  %v42_v2 = vld [vmem:[#allocation2] sm:$0xff]  ;;  %v44_v4 = vld [vmem:[#allocation2 + $0x10] sm:$0xff]  ;;  %v45_v5 = vld [vmem:[#allocation2 + $0x18] sm:$0xff]  ;;  %v235_v12 = vmov 0.0  }
  0x15   :  { %31 = vperm.xlu0 %182, %v26_v1   ;;  %v27_v6 = vld [vmem:[%s288_s0 + $0x8] sm:$0xff]  ;;  %v168_v7 = vpack.c.bf16 %v43_v3, %v42_v2  ;;  %v172_v8 = vpack.c.bf16 %v45_v5, %v44_v4  ;;  %v29_v10 = vand.u32 127, %v28_v9  ;;  %s236_s0 = smov [#allocation5]  }
  0x16   :  { %s135_s1 = sshll.u32 %s236_s0, 4  ;;  %s136_s1 = int_to_ptr.vmem [resolvable:$true] %s135_s1 }
  0x17   :  { %169 = vmatprep.subr.bf16.mxu0 %v168_v7  ;;  %s205_s27 = scalar_lea.vmem %s136_s1, 256  ;;  %p210_p9 = scmp.lt.s32.totalorder %s136_s1, %s136_s1 }
  0x18   :  { %171 = vmatpush3.bf16.msra.mxu0 %v168_v7  ;;  %p206_p8 = scmp.ne.s32.totalorder %s136_s1, %s205_s27  ;;  %p211_p10 = scmp.lt.s32.totalorder %s205_s27, %s205_s27 }
  0x19   :  { %34 = vperm.xlu0 %182, %v27_v6   ;;  %173 = vmatprep.subr.bf16.mxu0 %v172_v8 }
  0x1a   :  { %p212_p11 = por %p211_p10, %p210_p9 }
  0x1c   :  { %175 = vmatpush3.bf16.msra.mxu0 %v172_v8  ;;  %p213_p12 = pnand %p212_p11, %p206_p8 }
  0x94   :  { %v32_v11 = vpop.permute.xlu0 %31 }
  0x95   :  { %vm36_vm1 = vcmp.eq.s32.totalorder %v32_v11, %v29_v10 }
  0x96   :  { %v147_v13 = vsel %vm36_vm1, 1.0, %v235_v12 }
  0x97   :  { %165 = vmatprep.mubr.msk.f32.mxu0 %vm46_vm0, %v147_v13 }
  0x98   :  { %v35_v14 = vpop.permute.xlu0 %34 }
  0x99   :  { %vm37_vm2 = vcmp.eq.s32.totalorder %v35_v14, %v29_v10 }
  0x9a   :  { %v148_v15 = vsel %vm37_vm2, 1.0, %v235_v12 }
  0x9b   :  { %166 = vmatmul.mubr.msk.f32.vlgmr.msra.gmra.mrb[0].mxu0 %vm46_vm0, %v148_v15 }
 0x16e   :  { %v167_v16 = vpop.f32.mrb[0].mxu0 }
 0x16f   :  { %129 = vst [vmem:[#allocation5 + $0x8] sm:$0xff] %v167_v16  ;;  %v119_v17 = vpop.f32.mrb[1].mxu0 }
 0x170   :  { %128 = vst [vmem:[#allocation5] sm:$0xff] %v119_v17 }
 0x171   :  { %216 = shalt.err (!%p213_p12)
}
 0x172   :  { %s217_s30 = scalar_lea.hbm %s290_s2, 256 }
 0x173   :  { %p218_p13 = scmp.ne.s32.totalorder %s290_s2, %s217_s30  ;;  %p221_p0 = scmp.lt.u32.totalorder %s217_s30, %s290_s2 }
 0x175   :  { %p223_p1 = pnand %p221_p0, %p218_p13 }
 0x177   :  { %226 = shalt.err (!%p223_p1)
}
 0x178   :  { %141 = dma.vmem_to_hbm [thread:$0]  %s136_s1, 256, %s290_s2, [#allocation4], %s232_s19, %s232_s19, %s233_s20  }
 0x179   :  { %229 = dma.done.wait [#allocation4], 256  }
 0x17a   :  { %230 = vsyncadd [#allocation4], 4294967040 }
 0x17b   :  { %145 = vsyncpa [#allocation3], 1 }
 0x17c   :  { %146 = vsyncpa [#allocation4], 1 }

</bundles_post_ra>
